<compile_context>
chip_gen: v5e
topology: v5e:2x2
jax: 0.10.0
libtpu: 0.0.40
codegen_flags: <defaults>
</compile_context>

<pallas_src>
import jax
import jax.numpy as jnp
from jax.experimental import pallas as pl
from jax.experimental.pallas import tpu as pltpu


def _conv_bn_relu_kernel(x_ref, w_ref, b_ref, o_ref):
    # x_ref: (C_in, TL)      activation tile (lanes = L)
    # w_ref: (C_out, C_in)   conv weight with BN scale folded in (VMEM-resident)
    # b_ref: (C_out, 1)      folded bias = (conv_b - mean) * scale + beta
    # o_ref: (C_out, TL)
    y = jnp.dot(w_ref[...], x_ref[...], preferred_element_type=jnp.float32)
    y = y + b_ref[...]
    o_ref[...] = jnp.maximum(y, 0.0).astype(o_ref.dtype)


# Conservative budget for the double-buffered activation/output tiles; leaves
# headroom for the resident weight/bias inside v5e/v6e/v7x scoped VMEM limits.
_TILE_VMEM_BUDGET = 24 * 1024 * 1024


def _choose_tile_l(L, c_in, c_out, itemsize):
    """Pick a lane-dense tile along L (multiple of 128) that fits VMEM."""
    if L <= 1024:
        # Single block along L; full-extent blocks are always legal.
        return L
    per_col = 2 * (c_in + c_out) * itemsize      # double-buffered x + out columns
    tl = (_TILE_VMEM_BUDGET // per_col) // 128 * 128
    return int(max(128, min(tl, 4096)))


def conv_bn_relu_1d(x_ncl, conv_w, conv_b, bn_gamma, bn_beta, bn_mean, bn_var,
                    eps=1e-5, tile_l=None, compute_dtype=None,
                    vmem_limit_bytes=48 * 1024 * 1024):
    """Forward of ConvBNReLU1D (kernel_size=1, eval-mode BN, ReLU) in NCL layout.

    x_ncl:   (N, C_in, L)
    conv_w:  (C_out, C_in, 1)
    conv_b:  (C_out,)
    bn_*:    (C_out,)
    returns: (N, C_out, L)
    """
    N, C_in, L = x_ncl.shape
    C_out = conv_w.shape[0]

    # --- parameter folding (tiny, done once in the wrapper) ---
    scale = bn_gamma / jnp.sqrt(bn_var + eps)                    # (C_out,)
    w_scaled = conv_w[:, :, 0] * scale[:, None]                  # (C_out, C_in)
    bias = ((conv_b - bn_mean) * scale + bn_beta).reshape(C_out, 1)

    if compute_dtype is not None:
        x_ncl = x_ncl.astype(compute_dtype)
        w_scaled = w_scaled.astype(compute_dtype)
    bias = bias.astype(jnp.float32)                              # f32 epilogue

    itemsize = jnp.dtype(x_ncl.dtype).itemsize
    if tile_l is None:
        tile_l = _choose_tile_l(L, C_in, C_out, itemsize)
    tile_l = min(tile_l, L)

    # Pad L up to a multiple of the tile (padded columns sliced off below).
    num_l_blocks = pl.cdiv(L, tile_l)
    L_pad = num_l_blocks * tile_l
    if L_pad != L:
        x_ncl = jnp.pad(x_ncl, ((0, 0), (0, 0), (0, L_pad - L)))

    grid = (N, num_l_blocks)

    cost = pl.CostEstimate(
        flops=2 * N * L_pad * C_in * C_out,
        transcendentals=0,
        bytes_accessed=itemsize * (N * L_pad * C_in + C_in * C_out
                                   + N * L_pad * C_out),
    )

    out_padded = pl.pallas_call(
        _conv_bn_relu_kernel,
        out_shape=jax.ShapeDtypeStruct((N, C_out, L_pad), x_ncl.dtype),
        grid=grid,
        in_specs=[
            # Activation tile: batch dim squeezed, lanes = L tile.
            pl.BlockSpec((None, C_in, tile_l), lambda n, l: (n, 0, l)),
            # Resident folded weight (constant index map -> stays in VMEM).
            pl.BlockSpec((C_out, C_in), lambda n, l: (0, 0)),
            # Resident folded bias.
            pl.BlockSpec((C_out, 1), lambda n, l: (0, 0)),
        ],
        out_specs=pl.BlockSpec((None, C_out, tile_l), lambda n, l: (n, 0, l)),
        compiler_params=pltpu.CompilerParams(
            dimension_semantics=("parallel", "parallel"),
            vmem_limit_bytes=vmem_limit_bytes,
        ),
        cost_estimate=cost,
    )(x_ncl, w_scaled, bias)

    if L_pad != L:
        out_padded = out_padded[:, :, :L]
    return out_padded


def _reference(x_ncl, conv_w, conv_b, bn_gamma, bn_beta, bn_mean, bn_var,
               eps=1e-5):
    # Pure-JAX reference matching PyTorch Conv1d(k=1) + BatchNorm1d(eval) + ReLU.
    z = jnp.einsum('ncl,oc->nol', x_ncl, conv_w[:, :, 0]) + conv_b[None, :, None]
    z = (z - bn_mean[None, :, None]) / jnp.sqrt(bn_var + eps)[None, :, None]
    z = z * bn_gamma[None, :, None] + bn_beta[None, :, None]
    return jnp.maximum(z, 0.0)


def _make_params(key, N, C_in, C_out, L):
    k1, k2, k3, k4, k5, k6, k7 = jax.random.split(key, 7)
    x = jax.random.normal(k1, (N, C_in, L), dtype=jnp.float32)
    conv_w = jax.random.normal(k2, (C_out, C_in, 1), dtype=jnp.float32) * 0.5
    conv_b = jax.random.normal(k3, (C_out,), dtype=jnp.float32) * 0.1
    bn_gamma = 1.0 + 0.1 * jax.random.normal(k4, (C_out,), dtype=jnp.float32)
    bn_beta = 0.1 * jax.random.normal(k5, (C_out,), dtype=jnp.float32)
    bn_mean = 0.1 * jax.random.normal(k6, (C_out,), dtype=jnp.float32)
    bn_var = jnp.abs(jax.random.normal(k7, (C_out,), dtype=jnp.float32)) + 0.5
    return x, conv_w, conv_b, bn_gamma, bn_beta, bn_mean, bn_var


if __name__ == "__main__":
    key = jax.random.PRNGKey(0)
    k_a, k_b = jax.random.split(key)

    # Case 1: small shapes consistent with the module (single L block).
    N, C_in, C_out, L = 2, 4, 8, 16
    args = _make_params(k_a, N, C_in, C_out, L)
    out = jax.block_until_ready(conv_bn_relu_1d(*args))
    ref = _reference(*args)
    assert out.shape == (N, C_out, L)
    assert jnp.allclose(out, ref, atol=1e-5, rtol=1e-5), "mismatch vs reference (case 1)"

    # Case 2: exercise the tiled / padded path (multiple lane-dense L tiles).
    N2, C_in2, C_out2, L2 = 2, 4, 8, 384
    args2 = _make_params(k_b, N2, C_in2, C_out2, L2)
    out2 = jax.block_until_ready(conv_bn_relu_1d(*args2, tile_l=128))
    ref2 = _reference(*args2)
    assert out2.shape == (N2, C_out2, L2)
    assert jnp.allclose(out2, ref2, atol=1e-5, rtol=1e-5), "mismatch vs reference (case 2)"

    print("KERNEL_OK")
</pallas_src>

<mosaic_0001>
module attributes {stable_mosaic.version = 11 : i64} {
  func.func @_conv_bn_relu_kernel(%arg0: i32, %arg1: i32, %arg2: memref<1x4x16xf32, #tpu.memory_space<vmem>>, %arg3: memref<8x4xf32, #tpu.memory_space<vmem>>, %arg4: memref<8x1xf32, #tpu.memory_space<vmem>>, %arg5: memref<1x8x16xf32, #tpu.memory_space<vmem>>) attributes {dimension_semantics = [#tpu.dimension_semantics<parallel>, #tpu.dimension_semantics<parallel>], iteration_bounds = array<i64: 2, 1>, scalar_prefetch = 0 : i64, scratch_operands = 0 : i64, tpu.core_type = #tpu.core_type<tc>, window_params = [{transform_indices = @transform_0, window_bounds = array<i64: 1, 4, 16>}, {pipeline_mode = #tpu.pipeline_mode<synchronous>, transform_indices = @transform_1, window_bounds = array<i64: 8, 4>}, {pipeline_mode = #tpu.pipeline_mode<synchronous>, transform_indices = @transform_2, window_bounds = array<i64: 8, 1>}, {transform_indices = @transform_3, window_bounds = array<i64: 1, 8, 16>}]} {
    %c0 = arith.constant 0 : index
    %c0_0 = arith.constant 0 : index
    %0 = vector.load %arg3[%c0, %c0_0] : memref<8x4xf32, #tpu.memory_space<vmem>>, vector<8x4xf32>
    %c0_1 = arith.constant 0 : index
    %c0_2 = arith.constant 0 : index
    %c0_3 = arith.constant 0 : index
    %1 = vector.load %arg2[%c0_1, %c0_2, %c0_3] : memref<1x4x16xf32, #tpu.memory_space<vmem>>, vector<1x4x16xf32>
    %2 = vector.shape_cast %1 : vector<1x4x16xf32> to vector<4x16xf32>
    %cst = arith.constant dense<0.000000e+00> : vector<8x16xf32>
    %3 = tpu.matmul %0, %2, %cst {dimension_numbers = #tpu.dot_dimension_numbers<[1], [0], [0], [1], [0, 0, 1, 1], [], []>} : vector<8x4xf32>, vector<4x16xf32>, vector<8x16xf32> -> vector<8x16xf32>
    %c0_4 = arith.constant 0 : index
    %c0_5 = arith.constant 0 : index
    %4 = vector.load %arg4[%c0_4, %c0_5] : memref<8x1xf32, #tpu.memory_space<vmem>>, vector<8x1xf32>
    %5 = vector.broadcast %4 : vector<8x1xf32> to vector<8x16xf32>
    %6 = arith.addf %3, %5 : vector<8x16xf32>
    %cst_6 = arith.constant 0.000000e+00 : f32
    %7 = vector.broadcast %cst_6 : f32 to vector<8x16xf32>
    %8 = arith.maximumf %6, %7 : vector<8x16xf32>
    %c0_7 = arith.constant 0 : index
    %c0_8 = arith.constant 0 : index
    %c0_9 = arith.constant 0 : index
    %9 = vector.load %arg5[%c0_7, %c0_8, %c0_9] : memref<1x8x16xf32, #tpu.memory_space<vmem>>, vector<1x8x16xf32>
    %10 = vector.shape_cast %9 : vector<1x8x16xf32> to vector<8x16xf32>
    %11 = vector.shape_cast %8 : vector<8x16xf32> to vector<1x8x16xf32>
    tpu.vector_store %arg5[%c0_7, %c0_8, %c0_9], %11 {strides = array<i32>} : memref<1x8x16xf32, #tpu.memory_space<vmem>>, vector<1x8x16xf32>,
    return
  }
  func.func @transform_0(%arg0: i32, %arg1: i32) -> (i32, i32, i32) {
    %c0_i32 = arith.constant 0 : i32
    %c0_i32_0 = arith.constant 0 : i32
    return %arg0, %c0_i32, %arg1 : i32, i32, i32
  }
  func.func @transform_1(%arg0: i32, %arg1: i32) -> (i32, i32) {
    %c0_i32 = arith.constant 0 : i32
    %c0_i32_0 = arith.constant 0 : i32
    %c0_i32_1 = arith.constant 0 : i32
    return %c0_i32, %c0_i32_0 : i32, i32
  }
  func.func @transform_2(%arg0: i32, %arg1: i32) -> (i32, i32) {
    %c0_i32 = arith.constant 0 : i32
    %c0_i32_0 = arith.constant 0 : i32
    %c0_i32_1 = arith.constant 0 : i32
    return %c0_i32, %c0_i32_0 : i32, i32
  }
  func.func @transform_3(%arg0: i32, %arg1: i32) -> (i32, i32, i32) {
    %c0_i32 = arith.constant 0 : i32
    %c0_i32_0 = arith.constant 0 : i32
    return %arg0, %c0_i32, %arg1 : i32, i32, i32
  }
}

</mosaic_0001>

<bundles_post_ra>
// kernel: tpu_custom_call.1
= control target key start
LH: loop header
LB: loop body
LE: loop exit
PB: predicated region body
PF: predicated region fallthrough
CT: control target
= control target key end

     0   :  { %8 = vsyncpa [#allocation3], 0  ;;  %s592_s0 = inlined_call_operand.vmem [shape: f32[2,4,16], index: 0, kind: input, shape index: {}]   ;;  %s593_s1 = inlined_call_operand.vmem [shape: f32[8,4], index: 1, kind: input, shape index: {}]   ;;  %s594_s2 = inlined_call_operand.vmem [shape: f32[8,1], index: 2, kind: input, shape index: {}]   ;;  %s595_s3 = inlined_call_operand.hbm [shape: f32[2,8,16], index: 3, kind: output, shape index: {}]  }
   0x1   :  { %10 = vsyncpa [#allocation3 + $0x1], 0  ;;  %s489_s12 = smov 0   ;;  %s491_s13 = smov 0  }
   0x2   :  { %s493_s14 = smov 0   ;;  %s495_s15 = smov 0  }
   0x3   :  { %s497_s16 = smov 0   ;;  %s499_s17 = smov 0  }
   0x4 LB: > { %s318_s18 = sadd.s32 4294967295, %s466_s17   ;;  %s319_s19 = sadd.s32 4294967294, %s466_s17   ;;  %s466_s17 = sphi %s499_s17, %s16_s17   ;;  %s462_s16 = sphi %s497_s16, %s602_s16   ;;  %s458_s15 = sphi %s495_s15, %s601_s15   ;;  %s454_s14 = sphi %s493_s14, %s600_s14   ;;  %s450_s13 = sphi %s491_s13, %s599_s13   ;;  %s446_s12 = sphi %s489_s12, %s598_s12  }
   0x5   : > { %s28_s20 = sadd.s32 1, %s462_s16  ;;  %s107_s21 = sadd.s32 1, %s454_s14 }
   0x6   : > { %p30_p0 = scmp.ge.s32.totalorder %s28_s20, 2  ;;  %p117_p1 = scmp.ne.s32.totalorder %s454_s14, %s450_s13 }
   0x7   : > { %p118_p2 = scmp.eq.s32.totalorder %s318_s18, 1  ;;  %p123_p3 = scmp.ne.s32.totalorder %s450_s13, %s446_s12 }
   0x8   : > { %s604_s20 = smov (%p30_p0, %s28_s20), 0  ;;  %p124_p5 = scmp.eq.s32.totalorder %s319_s19, 1 }
   0x9   : > { %p529_p4 = por %p118_p2, %p117_p1  ;;  %s102_s23 = ssub.s32 %s462_s16, %s604_s20 }
   0xa   : > { %p322_p6 = scmp.ge.s32.totalorder %s466_s17, 1  ;;  %p105_p7 = scmp.eq.s32.totalorder %s102_s23, 0 }
   0xb   : > { %p536_p8 = por %p124_p5, %p123_p3  ;;  %p158_p9 = scmp.lt.s32.totalorder %s466_s17, 3 }
   0xc   : > { %s542_s25 = scalar_select %p105_p7, %s454_s14, %s107_s21  }
   0xd   : > { %p159_p10 = pnand %p322_p6, %p158_p9 }
   0xe   : > { %p184_p11 = scmp.lt.s32.totalorder (!%p159_p10), %s458_s15, 1  ;;  %s181_s8 = sand.u32 (!%p159_p10), 1, %s450_s13  }
   0xf   : > { %162 = sbr.rel (%p159_p10) target bundleno = 159 (0x9f), region = 32  ;;  %s323_s9 = sshll.u32 (!%p159_p10), %s181_s8, 3 }
  0x10   : > { %s328_s10 = sshll.u32 (!%p159_p10), %s458_s15, 3  ;;  %s183_s21 = scalar_lea.vmem (!%p159_p10), [#allocation2], %s323_s9 }
  0x11   : > { %s242_s19 = scalar_lea.hbm (!%p159_p10), %s595_s3, %s328_s10  ;;  %s244_s23 = sshll.u32 (!%p159_p10), %s183_s21, 4  ;;  %s245_s23 = int_to_ptr.vmem [resolvable:$true] %s244_s23 }
  0x12   : > { %s246_s26 = sshll.u32 (!%p159_p10), %s242_s19, 4  ;;  %s231_s27 = scalar_lea.sflag (!%p159_p10), [#allocation3], %s181_s8  ;;  %s247_s26 = int_to_ptr.hbm [resolvable:$true] %s246_s26 }
  0x13   : > { %s408_s4 = scalar_lea.hbm (!%p159_p10), %s595_s3, 16 }
  0x14   : > { %v193_v0 = vld [vmem:[%s594_s2] sm:$0xff]  ;;  %v468_v1 = vmov 0   ;;  %s185_s28 = scalar_select %p184_p11, %s458_s15, 1  ;;  %vm203_vm0 = vcmask 1043456   ;;  %vm199_vm1 = vcmask 31744   ;;  %vm228_vm2 = vcmask 130048  }
  0x15   : > { %387 = vset.pattern.permute.xlu0 %v468_v1  ;;  %v191_v2 = vld [vmem:[%s593_s1] sm:$0xff] }
  0x16   : > { %196 = vperm.xlu0 %387, %v193_v0   ;;  %s324_s29 = sshll.u32 %s185_s28, 2  ;;  %s402_s28 = sshra.s32 %s247_s26, 4  ;;  %s403_s28 = int_to_ptr.hbm [resolvable:$true] %s402_s28 }
  0x17   : > { %s190_s5 = scalar_lea.vmem %s592_s0, %s324_s29  ;;  %s404_s15 = scalar_lea.hbm %s403_s28, 8 }
  0x18   : > { %v192_v3 = vld [vmem:[%s190_s5] sm:$0xf]  ;;  %p405_p12 = scmp.ne.s32.totalorder %s403_s28, %s404_s15  ;;  %p409_p1 = scmp.lt.s32.totalorder %s403_s28, %s595_s3 }
  0x19   : > { %325 = vmatpush.msk.msra.mxu0 %vm203_vm0, %v192_v3  ;;  %p410_p2 = scmp.lt.s32.totalorder %s408_s4, %s404_s15 }
  0x1a   : > { %326 = vmatmul.msk.f32.vlgmr.msra.gmra.mxu0 %vm199_vm1, %v191_v2  ;;  %p406_p13 = pnand %p405_p12, %p529_p4 }
  0x1b   : > { %p411_p3 = por %p410_p2, %p409_p1 }
  0x1c   : > { %p407_p0 = pneg %p406_p13 }
  0x1e   : > { %p412_p5 = pnand %p411_p3, %p407_p0 }
  0x88   : > { %v197_v4 = vpop.permute.xlu0 %196 }
  0x97   : > { %v224_v5 = vpop.f32.mrf.mxu0 }
  0x98   : > { %v225_v6 = vadd.f32 %v224_v5, %v197_v4 }
  0x9a   : > { %v227_v7 = vmax.f32 %v225_v6, 0.0 }
  0x9c   : > { %229 = vst.msk [vmem:[%s183_s21] sm:$0xff] %vm228_vm2, %v227_v7 }
  0x9d   : > { %415 = shalt.err (!%p412_p5)
}
  0x9e   : > { %331 = dma.vmem_to_hbm [thread:$0]  (%p529_p4), %s245_s23, 128, %s247_s26, %s231_s27  }
  0x9f PF: > { %p337_p6 = scmp.ge.s32.totalorder %s466_s17, 2  ;;  %s258_s7 = sand.u32 1, %s446_s12  }
  0xa0   : > { %s259_s8 = scalar_lea.sflag [#allocation3], %s258_s7 }
  0xa1   : > { %p334_p7 = pnand %p337_p6, %p536_p8 }
  0xa3   : > { %p335_p9 = pneg %p334_p7 }
  0xa5   : > { %441 = dma.done.wait (%p335_p9), %s259_s8, 128  }
  0xa6   : > { %443 = vsyncadd (%p335_p9), %s259_s8, 4294967168  ;;  %s16_s17 = sadd.s32 1, %s466_s17   ;;  %s598_s12 = smov %s450_s13 }
  0xa7   : > { %p13_p10 = scmp.ge.s32.totalorder %s16_s17, 4   ;;  %s599_s13 = smov %s454_s14 }
  0xa8   : > { %s600_s14 = smov %s542_s25  ;;  %s601_s15 = smov %s462_s16 }
  0xa9   : > { %s602_s16 = smov %s604_s20  ;;  %15 = sbr.rel (!%p13_p10) target bundleno = 4 (0x4), region = 67 }
  0xae   :  { %265 = vsyncpa [#allocation3], 1 }
  0xaf   :  { %267 = vsyncpa [#allocation3 + $0x1], 1 }

</bundles_post_ra>
